<compile_context>
chip_gen: v5e
topology: v5e:2x2
jax: 0.10.0
libtpu: 0.0.40
codegen_flags: <defaults>
</compile_context>

<pallas_src>
import functools

import jax
import jax.numpy as jnp
from jax.experimental import pallas as pl
from jax.experimental.pallas import tpu as pltpu


_EPS = 1e-5                        # nn.BatchNorm2d default eps
_MAX_TL = 65536                    # lane-tile cap (multiple of 128)
_TARGET_BLOCK_BYTES = 2 << 20      # ~2 MiB x-blocks (per perf feedback)
_FUSED_SLAB_F32_BYTES = 2 << 20    # single-pass gate: slab (as f32) must fit VMEM everywhere
_VMEM_LIMIT = 32 << 20             # safe on v5e (128 MiB phys), v6e (128), v7x (64)


def _round_up(x, m):
    return (x + m - 1) // m * m


def _channel_block(channels, itemsize):
    # dtype-aware sublane blocking: f32 -> 8, bf16/f16 -> 16, int8/fp8 -> 32
    blk = {4: 8, 2: 16, 1: 32}.get(itemsize, 8)
    return channels if channels <= blk else blk


# -----------------------------------------------------------------------------
# Fused single-pass kernel: whole (N, c_blk, L) slab resident in VMEM.
# -----------------------------------------------------------------------------
def _fused_bn_kernel(x_ref, gamma_ref, beta_ref, o_ref, *, eps):
    x = x_ref[...].astype(jnp.float32)                       # (N, c_blk, L)
    cnt = jnp.float32(x.shape[0] * x.shape[2])                # true N*L (dims are full)
    s = jnp.sum(x, axis=(0, 2), keepdims=True)                # (1, c_blk, 1)
    ss = jnp.sum(x * x, axis=(0, 2), keepdims=True)
    mean = s / cnt
    var = jnp.maximum(ss / cnt - mean * mean, 0.0)            # clamp cancellation
    inv_std = jax.lax.rsqrt(var + eps)
    gamma = gamma_ref[...].reshape(1, -1, 1)                  # (1, c_blk, 1)
    beta = beta_ref[...].reshape(1, -1, 1)
    scale = gamma * inv_std
    shift = beta - mean * scale
    o_ref[...] = (x * scale + shift).astype(o_ref.dtype)


# -----------------------------------------------------------------------------
# Two-pass path, pass 1: per-channel partial sums / sums-of-squares.
# Grid = (n_split, nC, nB, nLh); reduction axes (batch blocks, lane tiles) last.
# -----------------------------------------------------------------------------
def _stats_kernel(x_ref, sum_ref, ssq_ref, *, n, n_blk, l, tl, nlh):
    b = pl.program_id(2)
    j = pl.program_id(3)

    @pl.when(jnp.logical_and(b == 0, j == 0))
    def _():
        sum_ref[...] = jnp.zeros_like(sum_ref)
        ssq_ref[...] = jnp.zeros_like(ssq_ref)

    x = x_ref[...].astype(jnp.float32)                        # (n_blk, c_blk, tl)

    # Mask out-of-range batch rows and spatial lanes of partial boundary tiles.
    # (valid_l <= 0 for the split's clamped overhang tile -> contributes nothing.)
    valid_b = n - b * n_blk
    valid_l = l - (pl.program_id(0) * nlh + j) * tl
    bi = jax.lax.broadcasted_iota(jnp.int32, (x.shape[0], x.shape[1]), 0)
    li = jax.lax.broadcasted_iota(jnp.int32, (x.shape[1], x.shape[2]), 1)
    mask = jnp.logical_and((bi < valid_b)[:, :, None], (li < valid_l)[None, :, :])
    xm = jnp.where(mask, x, 0.0)

    sum_ref[...] += jnp.sum(xm, axis=(0, 2), keepdims=True)   # (1, c_blk, 1)
    ssq_ref[...] += jnp.sum(xm * xm, axis=(0, 2), keepdims=True)


# -----------------------------------------------------------------------------
# Two-pass path, pass 2: y = x * scale[c] + shift[c] (pure VPU, lane-dense blocks).
# -----------------------------------------------------------------------------
def _normalize_kernel(x_ref, ss_ref, o_ref):
    x = x_ref[...].astype(jnp.float32)                        # (n_blk, c_blk, tl)
    scale = ss_ref[0][None]                                   # (1, c_blk, 1)
    shift = ss_ref[1][None]
    o_ref[...] = (x * scale + shift).astype(o_ref.dtype)


def norm_layer_forward(x_nchw, gamma, beta, *, eps=_EPS, force_two_pass=False):
    """NormLayer(norm_type='bn').forward(x): BatchNorm2d with batch statistics."""
    N, C, H, W = x_nchw.shape
    L = H * W
    itemsize = jnp.dtype(x_nchw.dtype).itemsize
    c_blk = _channel_block(C, itemsize)
    nC = pl.cdiv(C, c_blk)

    x3 = x_nchw.reshape(N, C, L)                              # free reshape, no copy
    gamma2 = gamma.astype(jnp.float32).reshape(C, 1)
    beta2 = beta.astype(jnp.float32).reshape(C, 1)

    # ---------------- fused single-pass path (1R + 1W) ----------------
    if (not force_two_pass) and (N * c_blk * L * 4 <= _FUSED_SLAB_F32_BYTES):
        y3 = pl.pallas_call(
            functools.partial(_fused_bn_kernel, eps=float(eps)),
            out_shape=jax.ShapeDtypeStruct((N, C, L), x_nchw.dtype),
            grid_spec=pltpu.PrefetchScalarGridSpec(
                num_scalar_prefetch=0,
                grid=(nC,),
                in_specs=[
                    pl.BlockSpec((N, c_blk, L), lambda i: (0, i, 0)),
                    pl.BlockSpec((c_blk, 1), lambda i: (i, 0)),
                    pl.BlockSpec((c_blk, 1), lambda i: (i, 0)),
                ],
                out_specs=pl.BlockSpec((N, c_blk, L), lambda i: (0, i, 0)),
            ),
            compiler_params=pltpu.CompilerParams(
                dimension_semantics=("parallel",),
                vmem_limit_bytes=_VMEM_LIMIT,
            ),
        )(x3, gamma2, beta2)
        return y3.reshape(N, C, H, W)

    # ---------------- two-pass path (2R + 1W) ----------------
    TL = min(_round_up(L, 128), _MAX_TL)
    nL = pl.cdiv(L, TL)
    n_blk = max(1, min(N, _TARGET_BLOCK_BYTES // (c_blk * TL * itemsize)))
    nB = pl.cdiv(N, n_blk)
    # Split the spatial reduction across two parallel "halves" so both v7x
    # TensorCores get work when there is only one channel block.
    n_split = 2 if (nC == 1 and nL >= 2) else 1
    nLh = pl.cdiv(nL, n_split)

    def x_stats_map(s, i, b, j):
        # Clamp so the DMA never starts past the array; the overhang tile of an
        # odd-nL split is fully masked out in-kernel anyway.
        return (b, i, jnp.minimum(s * nLh + j, nL - 1))

    part_sum, part_ssq = pl.pallas_call(
        functools.partial(_stats_kernel, n=N, n_blk=n_blk, l=L, tl=TL, nlh=nLh),
        out_shape=(
            jax.ShapeDtypeStruct((n_split, C, 1), jnp.float32),
            jax.ShapeDtypeStruct((n_split, C, 1), jnp.float32),
        ),
        grid_spec=pltpu.PrefetchScalarGridSpec(
            num_scalar_prefetch=0,
            grid=(n_split, nC, nB, nLh),
            in_specs=[pl.BlockSpec((n_blk, c_blk, TL), x_stats_map)],
            out_specs=(
                pl.BlockSpec((1, c_blk, 1), lambda s, i, b, j: (s, i, 0)),
                pl.BlockSpec((1, c_blk, 1), lambda s, i, b, j: (s, i, 0)),
            ),
        ),
        compiler_params=pltpu.CompilerParams(
            dimension_semantics=("parallel", "parallel", "arbitrary", "arbitrary"),
            vmem_limit_bytes=_VMEM_LIMIT,
        ),
    )(x3)

    # Tiny per-channel glue (negligible vs the HBM-bound passes).
    count = jnp.float32(N * L)
    ch_sum = jnp.sum(part_sum, axis=0)                        # (C, 1)
    ch_ssq = jnp.sum(part_ssq, axis=0)
    mean = ch_sum / count
    var = jnp.maximum(ch_ssq / count - mean * mean, 0.0)
    inv_std = jax.lax.rsqrt(var + jnp.float32(eps))
    scale = gamma2 * inv_std
    shift = beta2 - mean * scale
    ss = jnp.stack([scale, shift], axis=0)                    # (2, C, 1)

    y3 = pl.pallas_call(
        _normalize_kernel,
        out_shape=jax.ShapeDtypeStruct((N, C, L), x_nchw.dtype),
        grid_spec=pltpu.PrefetchScalarGridSpec(
            num_scalar_prefetch=0,
            grid=(nB, nC, nL),
            in_specs=[
                pl.BlockSpec((n_blk, c_blk, TL), lambda b, i, j: (b, i, j)),
                pl.BlockSpec((2, c_blk, 1), lambda b, i, j: (0, i, 0)),
            ],
            out_specs=pl.BlockSpec((n_blk, c_blk, TL), lambda b, i, j: (b, i, j)),
        ),
        compiler_params=pltpu.CompilerParams(
            dimension_semantics=("parallel", "parallel", "parallel"),
            vmem_limit_bytes=_VMEM_LIMIT,
        ),
    )(x3, ss)

    return y3.reshape(N, C, H, W)


# -----------------------------------------------------------------------------
# Reference + tests
# -----------------------------------------------------------------------------
def _reference_bn(x, gamma, beta, eps=_EPS):
    """Pure-JAX reference: BatchNorm2d forward with batch statistics (training mode)."""
    mean = jnp.mean(x, axis=(0, 2, 3), keepdims=True)
    var = jnp.var(x, axis=(0, 2, 3), keepdims=True)           # biased, as BN uses
    xhat = (x - mean) * jax.lax.rsqrt(var + eps)
    return xhat * gamma.reshape(1, -1, 1, 1) + beta.reshape(1, -1, 1, 1)


def _check(key, shape, tol, **kw):
    k_x, k_g, k_b = jax.random.split(key, 3)
    _, C, _, _ = shape
    x = jax.random.normal(k_x, shape, dtype=jnp.float32)
    gamma = 1.0 + 0.1 * jax.random.normal(k_g, (C,), dtype=jnp.float32)
    beta = 0.1 * jax.random.normal(k_b, (C,), dtype=jnp.float32)
    out = jax.block_until_ready(norm_layer_forward(x, gamma, beta, **kw))
    ref = _reference_bn(x, gamma, beta)
    assert out.shape == shape, out.shape
    err = float(jnp.max(jnp.abs(out - ref)))
    assert err <= tol, (shape, kw, err)


if __name__ == "__main__":
    key = jax.random.PRNGKey(0)
    k0, k1, k2 = jax.random.split(key, 3)

    # Primary small example (fused single-pass path).
    _check(k0, (2, 4, 16, 16), 1e-4)
    # Two-pass path: partial channel block (C=12, c_blk=8) + partial lane tile.
    _check(k1, (3, 12, 20, 20), 1e-3, force_two_pass=True)
    # Two-pass path with multiple lane tiles: 2-way reduction split (single channel
    # block), partial batch block and the clamped overhang tile.
    _check(k2, (3, 4, 400, 400), 2e-3)

    print("KERNEL_OK")
</pallas_src>

<mosaic_0001>
module attributes {stable_mosaic.version = 11 : i64} {
  func.func @_fused_bn_kernel(%arg0: i32, %arg1: memref<2x4x256xf32, #tpu.memory_space<vmem>>, %arg2: memref<4x1xf32, #tpu.memory_space<vmem>>, %arg3: memref<4x1xf32, #tpu.memory_space<vmem>>, %arg4: memref<2x4x256xf32, #tpu.memory_space<vmem>>) attributes {dimension_semantics = [#tpu.dimension_semantics<parallel>], iteration_bounds = array<i64: 1>, scalar_prefetch = 0 : i64, scratch_operands = 0 : i64, tpu.core_type = #tpu.core_type<tc>, window_params = [{transform_indices = @transform_0, window_bounds = array<i64: 2, 4, 256>}, {transform_indices = @transform_1, window_bounds = array<i64: 4, 1>}, {transform_indices = @transform_2, window_bounds = array<i64: 4, 1>}, {transform_indices = @transform_3, window_bounds = array<i64: 2, 4, 256>}]} {
    %c0 = arith.constant 0 : index
    %c0_0 = arith.constant 0 : index
    %c0_1 = arith.constant 0 : index
    %0 = vector.load %arg1[%c0, %c0_0, %c0_1] : memref<2x4x256xf32, #tpu.memory_space<vmem>>, vector<2x4x256xf32>
    %cst = arith.constant dense<0.000000e+00> : vector<4xf32>
    %1 = vector.multi_reduction <add>, %0, %cst [0, 2] : vector<2x4x256xf32> to vector<4xf32>
    %2 = vector.shape_cast %1 : vector<4xf32> to vector<1x4x1xf32>
    %3 = arith.mulf %0, %0 : vector<2x4x256xf32>
    %cst_2 = arith.constant dense<0.000000e+00> : vector<4xf32>
    %4 = vector.multi_reduction <add>, %3, %cst_2 [0, 2] : vector<2x4x256xf32> to vector<4xf32>
    %5 = vector.shape_cast %4 : vector<4xf32> to vector<1x4x1xf32>
    %cst_3 = arith.constant 5.120000e+02 : f32
    %6 = vector.broadcast %cst_3 : f32 to vector<1x4x1xf32>
    %7 = arith.divf %2, %6 : vector<1x4x1xf32>
    %cst_4 = arith.constant 5.120000e+02 : f32
    %8 = vector.broadcast %cst_4 : f32 to vector<1x4x1xf32>
    %9 = arith.divf %5, %8 : vector<1x4x1xf32>
    %10 = arith.mulf %7, %7 : vector<1x4x1xf32>
    %11 = arith.subf %9, %10 : vector<1x4x1xf32>
    %cst_5 = arith.constant 0.000000e+00 : f32
    %12 = vector.broadcast %cst_5 : f32 to vector<1x4x1xf32>
    %13 = arith.maximumf %11, %12 : vector<1x4x1xf32>
    %cst_6 = arith.constant 9.99999974E-6 : f32
    %14 = vector.broadcast %cst_6 : f32 to vector<1x4x1xf32>
    %15 = arith.addf %13, %14 : vector<1x4x1xf32>
    %16 = math.rsqrt %15 : vector<1x4x1xf32>
    %c0_7 = arith.constant 0 : index
    %c0_8 = arith.constant 0 : index
    %17 = vector.load %arg2[%c0_7, %c0_8] : memref<4x1xf32, #tpu.memory_space<vmem>>, vector<4x1xf32>
    %18 = vector.shape_cast %17 : vector<4x1xf32> to vector<1x4x1xf32>
    %c0_9 = arith.constant 0 : index
    %c0_10 = arith.constant 0 : index
    %19 = vector.load %arg3[%c0_9, %c0_10] : memref<4x1xf32, #tpu.memory_space<vmem>>, vector<4x1xf32>
    %20 = vector.shape_cast %19 : vector<4x1xf32> to vector<1x4x1xf32>
    %21 = arith.mulf %18, %16 : vector<1x4x1xf32>
    %22 = arith.mulf %7, %21 : vector<1x4x1xf32>
    %23 = arith.subf %20, %22 : vector<1x4x1xf32>
    %24 = vector.broadcast %21 : vector<1x4x1xf32> to vector<2x4x256xf32>
    %25 = arith.mulf %0, %24 : vector<2x4x256xf32>
    %26 = vector.broadcast %23 : vector<1x4x1xf32> to vector<2x4x256xf32>
    %27 = arith.addf %25, %26 : vector<2x4x256xf32>
    %c0_11 = arith.constant 0 : index
    %c0_12 = arith.constant 0 : index
    %c0_13 = arith.constant 0 : index
    %28 = vector.load %arg4[%c0_11, %c0_12, %c0_13] : memref<2x4x256xf32, #tpu.memory_space<vmem>>, vector<2x4x256xf32>
    tpu.vector_store %arg4[%c0_11, %c0_12, %c0_13], %27 {strides = array<i32>} : memref<2x4x256xf32, #tpu.memory_space<vmem>>, vector<2x4x256xf32>,
    return
  }
  func.func @transform_0(%arg0: i32) -> (i32, i32, i32) {
    %c0_i32 = arith.constant 0 : i32
    %c0_i32_0 = arith.constant 0 : i32
    %c0_i32_1 = arith.constant 0 : i32
    return %c0_i32, %arg0, %c0_i32_0 : i32, i32, i32
  }
  func.func @transform_1(%arg0: i32) -> (i32, i32) {
    %c0_i32 = arith.constant 0 : i32
    %c0_i32_0 = arith.constant 0 : i32
    return %arg0, %c0_i32 : i32, i32
  }
  func.func @transform_2(%arg0: i32) -> (i32, i32) {
    %c0_i32 = arith.constant 0 : i32
    %c0_i32_0 = arith.constant 0 : i32
    return %arg0, %c0_i32 : i32, i32
  }
  func.func @transform_3(%arg0: i32) -> (i32, i32, i32) {
    %c0_i32 = arith.constant 0 : i32
    %c0_i32_0 = arith.constant 0 : i32
    %c0_i32_1 = arith.constant 0 : i32
    return %c0_i32, %arg0, %c0_i32_0 : i32, i32, i32
  }
}

</mosaic_0001>

<bundles_post_ra>
// kernel: tpu_custom_call.1
= control target key start
LH: loop header
LB: loop body
LE: loop exit
PB: predicated region body
PF: predicated region fallthrough
CT: control target
= control target key end

     0   :  { %8 = vsyncpa [#allocation3], 0  ;;  %s281_s0 = inlined_call_operand.hbm [shape: f32[2,4,256], index: 0, kind: input, shape index: {}]   ;;  %s282_s1 = inlined_call_operand.vmem [shape: f32[4,1], index: 1, kind: input, shape index: {}]   ;;  %s283_s2 = inlined_call_operand.vmem [shape: f32[4,1], index: 2, kind: input, shape index: {}]   ;;  %s284_s3 = inlined_call_operand.hbm [shape: f32[2,4,256], index: 3, kind: output, shape index: {}]  }
   0x1   :  { %9 = vsyncpa [#allocation4], 0  ;;  %s14_s14 = sshll.u32 %s281_s0, 4  ;;  %s216_s15 = smov [#allocation2]   ;;  %s15_s14 = int_to_ptr.hbm [resolvable:$true] %s14_s14 }
   0x2   :  { %s16_s16 = sshll.u32 %s216_s15, 4  ;;  %s217_s17 = smov 128   ;;  %s17_s16 = int_to_ptr.vmem [resolvable:$true] %s16_s16 }
   0x3   :  { %s218_s18 = smov 8  }
   0x4   :  { %22 = dma.hbm_to_vmem [thread:$0]  %s15_s14, 256, %s17_s16, [#allocation3], %s217_s17, %s217_s17, %s218_s18  }
   0x5   :  { %212 = dma.done.wait [#allocation3], 256  }
   0x6   :  { %213 = vsyncadd [#allocation3], 4294967040  ;;  %v249_v0 = vld [vmem:[#allocation2] sm:$0xff]  ;;  %v251_v1 = vld [vmem:[#allocation2 + $0x8] sm:$0xff]  ;;  %vm46_vm0 = vcmask 1043456   ;;  %v219_v26 = vmov 512.0  }
   0x7   :  { %35 = vst [vmem:[#allocation1] ss:$2 sm:$0xff] %v249_v0  ;;  %v56_v2 = vmul.f32 %v249_v0, %v249_v0  ;;  %v57_v3 = vmul.f32 %v251_v1, %v251_v1  ;;  %160 = vrcp.f32 %v219_v26  ;;  %v220_v30 = vmov 0   ;;  %v103_v48 = vld [vmem:[%s282_s1] sm:$0xf]  ;;  %s222_s1 = smov [#allocation5]  }
   0x8   :  { %39 = vst [vmem:[#allocation1 + $0x10] ss:$2 sm:$0xff] %v251_v1  ;;  %158 = vset.pattern.permute.xlu1 %v220_v30  ;;  %159 = vset.pattern.permute.xlu0 %v220_v30  ;;  %v104_v52 = vld [vmem:[%s283_s2] sm:$0xf]  ;;  %v221_v54 = vmov 839922192  }
   0x9   :  { %v113_v55 = vunpack.c.l.s4 %v221_v54  ;;  %s136_s22 = sshll.u32 %s222_s1, 4  ;;  %s138_s25 = sshll.u32 %s284_s3, 4  ;;  %s137_s22 = int_to_ptr.vmem [resolvable:$true] %s136_s22  ;;  %s139_s25 = int_to_ptr.hbm [resolvable:$true] %s138_s25 }
   0xb   :  { %v114_v57 = vunpack.c.0.s8 %v113_v55 }
   0xd   :  { %v161_v27 = vpop.eup %160 }
   0xe   :  { %v36_v4 = vld.sshfl [vmem:[#allocation1] sm:$0xff pattern:$0x75316420]  ;;  %v37_v5 = vld.sshfl [vmem:[#allocation1 + $0x8] sm:$0xff pattern:$0x75316420]  ;;  %vm85_vm1 = vweird.f32 %v161_v27 }
   0xf   :  { %v40_v6 = vld.sshfl [vmem:[#allocation1 + $0x10] sm:$0xff pattern:$0x75316420]  ;;  %v41_v7 = vld.sshfl [vmem:[#allocation1 + $0x18] sm:$0xff pattern:$0x75316420] }
  0x10   :  { %v47_v8 = vsel %vm46_vm0, %v36_v4, 0.0  ;;  %v48_v9 = vsel %vm46_vm0, %v37_v5, 0.0  ;;  %v50_v10 = vsel %vm46_vm0, %v40_v6, 0.0  ;;  %60 = vst [vmem:[#allocation1] ss:$2 sm:$0xff] %v56_v2  ;;  %v52_v12 = vsel %vm46_vm0, %v41_v7, 0.0 }
  0x11   :  { %v49_v11 = vadd.f32 %v48_v9, %v47_v8  ;;  %64 = vst [vmem:[#allocation1 + $0x10] ss:$2 sm:$0xff] %v57_v3  ;;  %v81_v28 = vmul.f32 512.0, %v161_v27 }
  0x13   :  { %v51_v13 = vadd.f32 %v50_v10, %v49_v11  ;;  %v82_v29 = vsub.f32 1.0, %v81_v28 }
  0x15   :  { %v53_v14 = vadd.f32 %v52_v12, %v51_v13  ;;  %v83_v31 = vmul.f32 %v161_v27, %v82_v29 }
  0x17   :  { %54 = vadd.xlane.f32.xlu0 %v53_v14  ;;  %v61_v15 = vld.sshfl [vmem:[#allocation1] sm:$0xff pattern:$0x75316420]  ;;  %v62_v16 = vld.sshfl [vmem:[#allocation1 + $0x8] sm:$0xff pattern:$0x75316420]  ;;  %v84_v32 = vadd.f32 %v161_v27, %v83_v31 }
  0x18   :  { %v65_v17 = vld.sshfl [vmem:[#allocation1 + $0x10] sm:$0xff pattern:$0x75316420]  ;;  %v66_v18 = vld.sshfl [vmem:[#allocation1 + $0x18] sm:$0xff pattern:$0x75316420] }
  0x19   :  { %v71_v19 = vsel %vm46_vm0, %v61_v15, 0.0  ;;  %v72_v20 = vsel %vm46_vm0, %v62_v16, 0.0  ;;  %v74_v21 = vsel %vm46_vm0, %v65_v17, 0.0  ;;  %v76_v23 = vsel %vm46_vm0, %v66_v18, 0.0 }
  0x1a   :  { %v73_v22 = vadd.f32 %v72_v20, %v71_v19  ;;  %v86_v34 = vsel %vm85_vm1, %v161_v27, %v84_v32 }
  0x1c   :  { %v75_v24 = vadd.f32 %v74_v21, %v73_v22 }
  0x1e   :  { %v77_v25 = vadd.f32 %v76_v23, %v75_v24 }
  0x20   :  { %78 = vadd.xlane.f32.xlu0 %v77_v25 }
  0x8a   :  { %v55_v33 = vpop.xlane.xlu0 %54 }
  0x8b   :  { %v87_v35 = vmul.f32 %v86_v34, %v55_v33 }
  0x8d   :  { %v89_v37 = vmul.f32 %v87_v35, %v87_v35 }
  0x93   :  { %v79_v36 = vpop.xlane.xlu0 %78 }
  0x94   :  { %v88_v38 = vmul.f32 %v86_v34, %v79_v36 }
  0x96   :  { %v90_v39 = vsub.f32 %v88_v38, %v89_v37 }
  0x98   :  { %v91_v40 = vmax.f32 %v90_v39, 0.0 }
  0x9a   :  { %v92_v41 = vadd.f32 1e-05, %v91_v40 }
  0x9c   :  { %162 = vrsqrt.f32 %v92_v41  ;;  %vm99_vm3 = vweird.f32 %v92_v41 }
  0xa2   :  { %v163_v42 = vpop.eup %162 }
  0xa3   :  { %v94_v43 = vmul.f32 %v163_v42, %v92_v41  ;;  %vm100_vm2 = vweird.f32 %v163_v42 }
  0xa4   :  { %vm101_vm4 = vmor %vm99_vm3, %vm100_vm2 }
  0xa5   :  { %v95_v44 = vmul.f32 %v163_v42, %v94_v43 }
  0xa7   :  { %v96_v45 = vmul.f32 0.5, %v95_v44 }
  0xa9   :  { %v97_v46 = vsub.f32 1.5, %v96_v45 }
  0xab   :  { %v98_v47 = vmul.f32 %v163_v42, %v97_v46 }
  0xad   :  { %v102_v49 = vsel %vm101_vm4, %v163_v42, %v98_v47 }
  0xae   :  { %v105_v50 = vmul.f32 %v103_v48, %v102_v49 }
  0xb0   :  { %110 = vperm.xlu1 %158, %v105_v50   ;;  %v106_v51 = vmul.f32 %v105_v50, %v87_v35 }
  0xb2   :  { %v107_v53 = vsub.f32 %v104_v52, %v106_v51 }
  0xb8   :  { %121 = vperm.xlu1 %158, %v107_v53  }
 0x122   :  { %v111_v56 = vpop.permute.xlu1 %110 }
 0x123   :  { %v115_v58 = vperm.slane %v111_v56, %v114_v57 }
 0x125   :  { %v117_v60 = vmul.f32 %v115_v58, %v249_v0  ;;  %v118_v61 = vmul.f32 %v115_v58, %v251_v1 }
 0x12a   :  { %v122_v59 = vpop.permute.xlu1 %121 }
 0x12b   :  { %v126_v62 = vperm.slane %v122_v59, %v114_v57 }
 0x12d   :  { %v128_v63 = vadd.f32 %v126_v62, %v117_v60  ;;  %v129_v2 = vadd.f32 %v126_v62, %v118_v61 }
 0x12f   :  { %130 = vst [vmem:[#allocation5] sm:$0xff] %v128_v63 }
 0x130   :  { %131 = vst [vmem:[#allocation5 + $0x8] sm:$0xff] %v129_v2 }
 0x131   :  { %144 = dma.vmem_to_hbm [thread:$0]  %s137_s22, 256, %s139_s25, [#allocation4], %s217_s17, %s217_s17, %s218_s18  }
 0x132   :  { %214 = dma.done.wait [#allocation4], 256  }
 0x133   :  { %215 = vsyncadd [#allocation4], 4294967040 }
 0x134   :  { %149 = vsyncpa [#allocation3], 1 }
 0x135   :  { %150 = vsyncpa [#allocation4], 1 }

</bundles_post_ra>
